<compile_context>
chip_gen: v5e
topology: v5e:2x2
jax: 0.10.0
libtpu: 0.0.40
codegen_flags: <defaults>
</compile_context>

<pallas_src>
import jax
import jax.numpy as jnp
import numpy as np
from jax.experimental import pallas as pl
from jax.experimental.pallas import tpu as pltpu

# ---------------- model hyper-parameters (small, consistent with the module) ----
B = 2          # batch
S = 16         # sequence length
E = 64         # emb_dim
H = 64         # hidden_dim
NH = 4         # nb_heads
HD = H // NH   # head_dim
C = 4          # conv_size (causal depthwise conv, conv_size in [2,3,4])
EPS = 1e-5     # RMSNorm eps
R = B * S      # rows of the fused (batch*seq) slab


# ---------------- Pallas kernel: full LSTMBlock forward, one invocation ---------
def lstm_block_kernel(x_ref, wnorm_ref, win_t_ref, wout_t_ref, convt_ref, o_ref):
    x = x_ref[...]                                            # (R, E)

    # --- RMSNorm ---
    ms = jnp.mean(x * x, axis=-1, keepdims=True)
    xn = x * jax.lax.rsqrt(ms + EPS) * wnorm_ref[...]         # (R, E)

    # --- W_in projection; permuted output layout [fi(2H) | out1(H) | h(H)] ---
    pre = jnp.dot(xn, win_t_ref[...], preferred_element_type=jnp.float32)  # (R, 4H)
    fi = pre[:, : 2 * H]                                      # (R, 2H)  full lane tile
    out1 = pre[:, 2 * H: 3 * H]                               # (R, H)
    hpart = pre[:, 3 * H:]                                    # (R, H)

    # local time index within each sequence (row = b*S + t)
    t_fi = jax.lax.broadcasted_iota(jnp.int32, (R, 2 * H), 0) % S
    t_h = jax.lax.broadcasted_iota(jnp.int32, (R, H), 0) % S

    # --- causal depthwise conv1d along time: roll (XLU) + row mask, no concats ---
    wconv = convt_ref[...]                                    # (C, 2H)
    y = fi * wconv[C - 1: C, :]                               # delay d = 0 tap
    for d in range(1, C):
        shifted = pltpu.roll(fi, d, axis=0)                   # row t <- fi[t - d]
        shifted = jnp.where(t_fi >= d, shifted, 0.0)          # causal pad + batch boundary
        y = y + shifted * wconv[C - 1 - d: C - d, :]

    # --- gates: one sigmoid over the full 128-lane block, contiguous f/i halves ---
    gates = jax.nn.sigmoid(y)                                 # (R, 2H)
    f = gates[:, :H]
    i = gates[:, H:]
    s = f + i + 1e-4
    r0 = pl.reciprocal(s, approx=True)                        # EUP slot
    denom = r0 * (2.0 - s * r0)                               # one Newton step -> near-exact
    a = f * denom                                             # (R, H)
    b = hpart * i * denom                                     # (R, H)

    # --- h_t = a_t * h_{t-1} + b_t (h_{-1}=0): log2(S)-step parallel affine scan ---
    A, Bv = a, b
    off = 1
    while off < S:
        A_s = jnp.where(t_h >= off, pltpu.roll(A, off, axis=0), 1.0)
        B_s = jnp.where(t_h >= off, pltpu.roll(Bv, off, axis=0), 0.0)
        Bv = Bv + A * B_s                                     # uses pre-update A
        A = A * A_s
        off *= 2
    hsc = Bv                                                  # (R, H)

    # --- output gate + W_out projection + residual ---
    gated = jax.nn.silu(out1) * hsc                           # silu(out1) * out2
    yout = jnp.dot(gated, wout_t_ref[...], preferred_element_type=jnp.float32)  # (R, E)
    o_ref[...] = x + yout


# ---------------- wrapper ----------------
@jax.jit
def lstm_block_forward(x, w_norm, w_in, w_out, conv_w):
    # Permute the fi channels (head, gate, dim) -> (gate, head, dim) so the
    # post-conv layout is [f_all | i_all] contiguous, and reorder the W_in row
    # blocks to [fi | out1 | h] so the 128-wide fi slab is lane-tile aligned.
    w_in_fi = w_in[2 * H:].reshape(NH, 2, HD, E).transpose(1, 0, 2, 3).reshape(2 * H, E)
    conv_fi = conv_w.reshape(NH, 2, HD, C).transpose(1, 0, 2, 3).reshape(2 * H, C)
    w_in_perm = jnp.concatenate([w_in_fi, w_in[:H], w_in[H:2 * H]], axis=0)   # (4H, E)

    win_t = w_in_perm.T                  # (E, 4H)
    wout_t = w_out.T                     # (H, E)
    convt = conv_fi.T                    # (C, 2H)
    wnorm2d = w_norm.reshape(1, E)       # (1, E)
    x2d = x.reshape(R, E)                # fold batch into rows (free in XLA)

    # TODO(synk): optional bf16 cast of matmul operands (v6e/v7x) skipped to stay
    # safely inside the 2e-3 reference tolerance; matmuls are not the bottleneck here.
    out2d = pl.pallas_call(
        lstm_block_kernel,
        out_shape=jax.ShapeDtypeStruct((R, E), jnp.float32),
        grid_spec=pltpu.PrefetchScalarGridSpec(
            num_scalar_prefetch=0,
            grid=(1,),                   # grid collapsed: one invocation does all of (B, S)
            in_specs=[
                pl.BlockSpec((R, E), lambda i: (0, 0)),
                pl.BlockSpec((1, E), lambda i: (0, 0)),
                pl.BlockSpec((E, 4 * H), lambda i: (0, 0)),
                pl.BlockSpec((H, E), lambda i: (0, 0)),
                pl.BlockSpec((C, 2 * H), lambda i: (0, 0)),
            ],
            out_specs=pl.BlockSpec((R, E), lambda i: (0, 0)),
        ),
        compiler_params=pltpu.CompilerParams(
            dimension_semantics=("arbitrary",)),
    )(x2d, wnorm2d, win_t, wout_t, convt)
    return out2d.reshape(B, S, E)


# ---------------- pure-JAX reference (mirrors the PyTorch forward) ----------------
def reference_forward(x, w_norm, w_in, w_out, conv_w):
    hp_prec = jax.lax.Precision.HIGHEST
    xn = x * jax.lax.rsqrt(jnp.mean(x * x, -1, keepdims=True) + EPS) * w_norm
    pre = jnp.einsum("bse,oe->bso", xn, w_in, precision=hp_prec)     # (B,S,4H)
    tmp, fi = pre[..., :2 * H], pre[..., 2 * H:]
    out1, h = tmp[..., :H], tmp[..., H:]
    fi = jnp.swapaxes(fi, 1, 2)                                      # (B, 2H, S)
    h = jnp.swapaxes(h, 1, 2)                                        # (B, H, S)
    fi_pad = jnp.pad(fi, ((0, 0), (0, 0), (C - 1, 0)))
    fi = sum(conv_w[None, :, k:k + 1] * fi_pad[:, :, k:k + S] for k in range(C))
    fi = fi.reshape(B * NH, 2 * HD, S)
    h = h.reshape(B * NH, HD, S)
    f, i = jax.nn.sigmoid(fi[:, :HD]), jax.nn.sigmoid(fi[:, HD:])
    denom = 1.0 / (f + i + 1e-4)
    a, b = f * denom, h * i * denom
    hp = jnp.zeros((B * NH, HD), jnp.float32)
    rows = []
    for t in range(S):
        hp = a[..., t] * hp + b[..., t]
        rows.append(hp)
    hsc = jnp.stack(rows, axis=-1)                                   # (B*NH, HD, S)
    out2 = jnp.swapaxes(hsc.reshape(B, H, S), 1, 2)                  # (B, S, H)
    out = jax.nn.silu(out1) * out2
    y = jnp.einsum("bsh,eh->bse", out, w_out, precision=hp_prec)
    return x + y


if __name__ == "__main__":
    key = jax.random.PRNGKey(0)
    kx, k1, k2, k3 = jax.random.split(key, 4)

    x = jax.random.normal(kx, (B, S, E), dtype=jnp.float32)
    w_norm = jnp.ones((E,), dtype=jnp.float32)                       # RMSNorm weight
    w_in = jax.random.normal(k1, (4 * H, E), jnp.float32) * (E ** -0.5)
    w_out = jax.random.normal(k2, (E, H), jnp.float32) * (H ** -0.5)
    conv_w = jax.random.normal(k3, (2 * H, C), jnp.float32) * (C ** -0.5)

    out = lstm_block_forward(x, w_norm, w_in, w_out, conv_w)
    out = jax.block_until_ready(out)

    ref = reference_forward(x, w_norm, w_in, w_out, conv_w)
    np.testing.assert_allclose(np.asarray(out), np.asarray(ref), rtol=2e-3, atol=2e-3)

    print("KERNEL_OK")
</pallas_src>

<mosaic_0001>
module attributes {stable_mosaic.version = 11 : i64} {
  func.func @lstm_block_kernel(%arg0: i32, %arg1: memref<32x64xf32, #tpu.memory_space<vmem>>, %arg2: memref<1x64xf32, #tpu.memory_space<vmem>>, %arg3: memref<64x256xf32, #tpu.memory_space<vmem>>, %arg4: memref<64x64xf32, #tpu.memory_space<vmem>>, %arg5: memref<4x128xf32, #tpu.memory_space<vmem>>, %arg6: memref<32x64xf32, #tpu.memory_space<vmem>>) attributes {dimension_semantics = [#tpu.dimension_semantics<arbitrary>], iteration_bounds = array<i64: 1>, scalar_prefetch = 0 : i64, scratch_operands = 0 : i64, tpu.core_type = #tpu.core_type<tc>, window_params = [{pipeline_mode = #tpu.pipeline_mode<synchronous>, transform_indices = @transform_0, window_bounds = array<i64: 32, 64>}, {pipeline_mode = #tpu.pipeline_mode<synchronous>, transform_indices = @transform_1, window_bounds = array<i64: 1, 64>}, {pipeline_mode = #tpu.pipeline_mode<synchronous>, transform_indices = @transform_2, window_bounds = array<i64: 64, 256>}, {pipeline_mode = #tpu.pipeline_mode<synchronous>, transform_indices = @transform_3, window_bounds = array<i64: 64, 64>}, {pipeline_mode = #tpu.pipeline_mode<synchronous>, transform_indices = @transform_4, window_bounds = array<i64: 4, 128>}, {pipeline_mode = #tpu.pipeline_mode<synchronous>, transform_indices = @transform_5, window_bounds = array<i64: 32, 64>}]} {
    %c0 = arith.constant 0 : index
    %c0_0 = arith.constant 0 : index
    %0 = vector.load %arg1[%c0, %c0_0] : memref<32x64xf32, #tpu.memory_space<vmem>>, vector<32x64xf32>
    %1 = arith.mulf %0, %0 : vector<32x64xf32>
    %cst = arith.constant dense<0.000000e+00> : vector<32xf32>
    %2 = vector.multi_reduction <add>, %1, %cst [1] : vector<32x64xf32> to vector<32xf32>
    %3 = vector.shape_cast %2 : vector<32xf32> to vector<32x1xf32>
    %cst_1 = arith.constant 6.400000e+01 : f32
    %4 = vector.broadcast %cst_1 : f32 to vector<32x1xf32>
    %5 = arith.divf %3, %4 : vector<32x1xf32>
    %cst_2 = arith.constant 9.99999974E-6 : f32
    %6 = vector.broadcast %cst_2 : f32 to vector<32x1xf32>
    %7 = arith.addf %5, %6 : vector<32x1xf32>
    %8 = math.rsqrt %7 : vector<32x1xf32>
    %9 = vector.broadcast %8 : vector<32x1xf32> to vector<32x64xf32>
    %10 = arith.mulf %0, %9 : vector<32x64xf32>
    %c0_3 = arith.constant 0 : index
    %c0_4 = arith.constant 0 : index
    %11 = vector.load %arg2[%c0_3, %c0_4] : memref<1x64xf32, #tpu.memory_space<vmem>>, vector<1x64xf32>
    %12 = vector.broadcast %11 : vector<1x64xf32> to vector<32x64xf32>
    %13 = arith.mulf %10, %12 : vector<32x64xf32>
    %c0_5 = arith.constant 0 : index
    %c0_6 = arith.constant 0 : index
    %14 = vector.load %arg3[%c0_5, %c0_6] : memref<64x256xf32, #tpu.memory_space<vmem>>, vector<64x256xf32>
    %cst_7 = arith.constant dense<0.000000e+00> : vector<32x256xf32>
    %15 = tpu.matmul %13, %14, %cst_7 {dimension_numbers = #tpu.dot_dimension_numbers<[1], [0], [0], [1], [0, 0, 1, 1], [], []>} : vector<32x64xf32>, vector<64x256xf32>, vector<32x256xf32> -> vector<32x256xf32>
    %16 = vector.extract_strided_slice %15 {offsets = [0, 0], sizes = [32, 128], strides = [1, 1]} : vector<32x256xf32> to vector<32x128xf32>
    %17 = vector.extract_strided_slice %15 {offsets = [0, 128], sizes = [32, 64], strides = [1, 1]} : vector<32x256xf32> to vector<32x64xf32>
    %18 = vector.extract_strided_slice %15 {offsets = [0, 192], sizes = [32, 64], strides = [1, 1]} : vector<32x256xf32> to vector<32x64xf32>
    %19 = tpu.iota {dimensions = array<i32: 0>} : vector<32x128xi32>
    %c16_i32 = arith.constant 16 : i32
    %c0_i32 = arith.constant 0 : i32
    %20 = arith.cmpi eq, %c16_i32, %c0_i32 : i32
    %c1_i32 = arith.constant 1 : i32
    %21 = arith.select %20, %c1_i32, %c16_i32 : i32
    %22 = vector.broadcast %21 : i32 to vector<32x128xi32>
    %23 = arith.remsi %19, %22 : vector<32x128xi32>
    %c0_i32_8 = arith.constant 0 : i32
    %24 = vector.broadcast %c0_i32_8 : i32 to vector<32x128xi32>
    %25 = arith.cmpi ne, %23, %24 : vector<32x128xi32>
    %c0_i32_9 = arith.constant 0 : i32
    %26 = vector.broadcast %c0_i32_9 : i32 to vector<32x128xi32>
    %27 = arith.cmpi slt, %23, %26 : vector<32x128xi32>
    %c0_i32_10 = arith.constant 0 : i32
    %28 = arith.cmpi slt, %21, %c0_i32_10 : i32
    %29 = vector.broadcast %28 : i1 to vector<32x128xi1>
    %30 = vector.broadcast %29 : vector<32x128xi1> to vector<32x128xi1>
    %31 = arith.xori %27, %30 : vector<32x128xi1>
    %32 = arith.andi %31, %25 : vector<32x128xi1>
    %33 = vector.broadcast %21 : i32 to vector<32x128xi32>
    %34 = arith.addi %23, %33 : vector<32x128xi32>
    %35 = arith.select %32, %34, %23 : vector<32x128xi1>, vector<32x128xi32>
    %36 = tpu.iota {dimensions = array<i32: 0>} : vector<32x64xi32>
    %c16_i32_11 = arith.constant 16 : i32
    %c0_i32_12 = arith.constant 0 : i32
    %37 = arith.cmpi eq, %c16_i32_11, %c0_i32_12 : i32
    %c1_i32_13 = arith.constant 1 : i32
    %38 = arith.select %37, %c1_i32_13, %c16_i32_11 : i32
    %39 = vector.broadcast %38 : i32 to vector<32x64xi32>
    %40 = arith.remsi %36, %39 : vector<32x64xi32>
    %c0_i32_14 = arith.constant 0 : i32
    %41 = vector.broadcast %c0_i32_14 : i32 to vector<32x64xi32>
    %42 = arith.cmpi ne, %40, %41 : vector<32x64xi32>
    %c0_i32_15 = arith.constant 0 : i32
    %43 = vector.broadcast %c0_i32_15 : i32 to vector<32x64xi32>
    %44 = arith.cmpi slt, %40, %43 : vector<32x64xi32>
    %c0_i32_16 = arith.constant 0 : i32
    %45 = arith.cmpi slt, %38, %c0_i32_16 : i32
    %46 = vector.broadcast %45 : i1 to vector<32x64xi1>
    %47 = vector.broadcast %46 : vector<32x64xi1> to vector<32x64xi1>
    %48 = arith.xori %44, %47 : vector<32x64xi1>
    %49 = arith.andi %48, %42 : vector<32x64xi1>
    %50 = vector.broadcast %38 : i32 to vector<32x64xi32>
    %51 = arith.addi %40, %50 : vector<32x64xi32>
    %52 = arith.select %49, %51, %40 : vector<32x64xi1>, vector<32x64xi32>
    %c0_17 = arith.constant 0 : index
    %c0_18 = arith.constant 0 : index
    %53 = vector.load %arg5[%c0_17, %c0_18] : memref<4x128xf32, #tpu.memory_space<vmem>>, vector<4x128xf32>
    %54 = vector.extract_strided_slice %53 {offsets = [3, 0], sizes = [1, 128], strides = [1, 1]} : vector<4x128xf32> to vector<1x128xf32>
    %55 = vector.broadcast %54 : vector<1x128xf32> to vector<32x128xf32>
    %56 = arith.mulf %16, %55 : vector<32x128xf32>
    %c1_i32_19 = arith.constant 1 : i32
    %57 = tpu.dynamic_rotate %16 by %c1_i32_19 dim 0 : vector<32x128xf32>, i32 -> vector<32x128xf32>
    %c1_i32_20 = arith.constant 1 : i32
    %58 = vector.broadcast %c1_i32_20 : i32 to vector<32x128xi32>
    %59 = arith.cmpi sge, %35, %58 : vector<32x128xi32>
    %cst_21 = arith.constant 0.000000e+00 : f32
    %60 = vector.broadcast %cst_21 : f32 to vector<32x128xf32>
    %61 = arith.select %59, %57, %60 : vector<32x128xi1>, vector<32x128xf32>
    %62 = vector.extract_strided_slice %53 {offsets = [2, 0], sizes = [1, 128], strides = [1, 1]} : vector<4x128xf32> to vector<1x128xf32>
    %63 = vector.broadcast %62 : vector<1x128xf32> to vector<32x128xf32>
    %64 = arith.mulf %61, %63 : vector<32x128xf32>
    %65 = arith.addf %56, %64 : vector<32x128xf32>
    %c2_i32 = arith.constant 2 : i32
    %66 = tpu.dynamic_rotate %16 by %c2_i32 dim 0 : vector<32x128xf32>, i32 -> vector<32x128xf32>
    %c2_i32_22 = arith.constant 2 : i32
    %67 = vector.broadcast %c2_i32_22 : i32 to vector<32x128xi32>
    %68 = arith.cmpi sge, %35, %67 : vector<32x128xi32>
    %cst_23 = arith.constant 0.000000e+00 : f32
    %69 = vector.broadcast %cst_23 : f32 to vector<32x128xf32>
    %70 = arith.select %68, %66, %69 : vector<32x128xi1>, vector<32x128xf32>
    %71 = vector.extract_strided_slice %53 {offsets = [1, 0], sizes = [1, 128], strides = [1, 1]} : vector<4x128xf32> to vector<1x128xf32>
    %72 = vector.broadcast %71 : vector<1x128xf32> to vector<32x128xf32>
    %73 = arith.mulf %70, %72 : vector<32x128xf32>
    %74 = arith.addf %65, %73 : vector<32x128xf32>
    %c3_i32 = arith.constant 3 : i32
    %75 = tpu.dynamic_rotate %16 by %c3_i32 dim 0 : vector<32x128xf32>, i32 -> vector<32x128xf32>
    %c3_i32_24 = arith.constant 3 : i32
    %76 = vector.broadcast %c3_i32_24 : i32 to vector<32x128xi32>
    %77 = arith.cmpi sge, %35, %76 : vector<32x128xi32>
    %cst_25 = arith.constant 0.000000e+00 : f32
    %78 = vector.broadcast %cst_25 : f32 to vector<32x128xf32>
    %79 = arith.select %77, %75, %78 : vector<32x128xi1>, vector<32x128xf32>
    %80 = vector.extract_strided_slice %53 {offsets = [0, 0], sizes = [1, 128], strides = [1, 1]} : vector<4x128xf32> to vector<1x128xf32>
    %81 = vector.broadcast %80 : vector<1x128xf32> to vector<32x128xf32>
    %82 = arith.mulf %79, %81 : vector<32x128xf32>
    %83 = arith.addf %74, %82 : vector<32x128xf32>
    %84 = arith.negf %83 : vector<32x128xf32>
    %85 = math.exp %84 : vector<32x128xf32>
    %cst_26 = arith.constant 1.000000e+00 : f32
    %86 = vector.broadcast %cst_26 : f32 to vector<32x128xf32>
    %87 = arith.addf %86, %85 : vector<32x128xf32>
    %88 = arith.divf %86, %87 : vector<32x128xf32>
    %89 = vector.extract_strided_slice %88 {offsets = [0, 0], sizes = [32, 64], strides = [1, 1]} : vector<32x128xf32> to vector<32x64xf32>
    %90 = vector.extract_strided_slice %88 {offsets = [0, 64], sizes = [32, 64], strides = [1, 1]} : vector<32x128xf32> to vector<32x64xf32>
    %91 = arith.addf %89, %90 : vector<32x64xf32>
    %cst_27 = arith.constant 9.99999974E-5 : f32
    %92 = vector.broadcast %cst_27 : f32 to vector<32x64xf32>
    %93 = arith.addf %91, %92 : vector<32x64xf32>
    %94 = tpu.reciprocal %93 {approx = true} : vector<32x64xf32> -> vector<32x64xf32>
    %95 = arith.mulf %93, %94 : vector<32x64xf32>
    %cst_28 = arith.constant 2.000000e+00 : f32
    %96 = vector.broadcast %cst_28 : f32 to vector<32x64xf32>
    %97 = arith.subf %96, %95 : vector<32x64xf32>
    %98 = arith.mulf %94, %97 : vector<32x64xf32>
    %99 = arith.mulf %89, %98 : vector<32x64xf32>
    %100 = arith.mulf %18, %90 : vector<32x64xf32>
    %101 = arith.mulf %100, %98 : vector<32x64xf32>
    %c1_i32_29 = arith.constant 1 : i32
    %102 = vector.broadcast %c1_i32_29 : i32 to vector<32x64xi32>
    %103 = arith.cmpi sge, %52, %102 : vector<32x64xi32>
    %c1_i32_30 = arith.constant 1 : i32
    %104 = tpu.dynamic_rotate %99 by %c1_i32_30 dim 0 : vector<32x64xf32>, i32 -> vector<32x64xf32>
    %cst_31 = arith.constant 1.000000e+00 : f32
    %105 = vector.broadcast %cst_31 : f32 to vector<32x64xf32>
    %106 = arith.select %103, %104, %105 : vector<32x64xi1>, vector<32x64xf32>
    %c1_i32_32 = arith.constant 1 : i32
    %107 = vector.broadcast %c1_i32_32 : i32 to vector<32x64xi32>
    %108 = arith.cmpi sge, %52, %107 : vector<32x64xi32>
    %c1_i32_33 = arith.constant 1 : i32
    %109 = tpu.dynamic_rotate %101 by %c1_i32_33 dim 0 : vector<32x64xf32>, i32 -> vector<32x64xf32>
    %cst_34 = arith.constant 0.000000e+00 : f32
    %110 = vector.broadcast %cst_34 : f32 to vector<32x64xf32>
    %111 = arith.select %108, %109, %110 : vector<32x64xi1>, vector<32x64xf32>
    %112 = arith.mulf %99, %111 : vector<32x64xf32>
    %113 = arith.addf %101, %112 : vector<32x64xf32>
    %114 = arith.mulf %99, %106 : vector<32x64xf32>
    %c2_i32_35 = arith.constant 2 : i32
    %115 = vector.broadcast %c2_i32_35 : i32 to vector<32x64xi32>
    %116 = arith.cmpi sge, %52, %115 : vector<32x64xi32>
    %c2_i32_36 = arith.constant 2 : i32
    %117 = tpu.dynamic_rotate %114 by %c2_i32_36 dim 0 : vector<32x64xf32>, i32 -> vector<32x64xf32>
    %cst_37 = arith.constant 1.000000e+00 : f32
    %118 = vector.broadcast %cst_37 : f32 to vector<32x64xf32>
    %119 = arith.select %116, %117, %118 : vector<32x64xi1>, vector<32x64xf32>
    %c2_i32_38 = arith.constant 2 : i32
    %120 = vector.broadcast %c2_i32_38 : i32 to vector<32x64xi32>
    %121 = arith.cmpi sge, %52, %120 : vector<32x64xi32>
    %c2_i32_39 = arith.constant 2 : i32
    %122 = tpu.dynamic_rotate %113 by %c2_i32_39 dim 0 : vector<32x64xf32>, i32 -> vector<32x64xf32>
    %cst_40 = arith.constant 0.000000e+00 : f32
    %123 = vector.broadcast %cst_40 : f32 to vector<32x64xf32>
    %124 = arith.select %121, %122, %123 : vector<32x64xi1>, vector<32x64xf32>
    %125 = arith.mulf %114, %124 : vector<32x64xf32>
    %126 = arith.addf %113, %125 : vector<32x64xf32>
    %127 = arith.mulf %114, %119 : vector<32x64xf32>
    %c4_i32 = arith.constant 4 : i32
    %128 = vector.broadcast %c4_i32 : i32 to vector<32x64xi32>
    %129 = arith.cmpi sge, %52, %128 : vector<32x64xi32>
    %c4_i32_41 = arith.constant 4 : i32
    %130 = tpu.dynamic_rotate %127 by %c4_i32_41 dim 0 : vector<32x64xf32>, i32 -> vector<32x64xf32>
    %cst_42 = arith.constant 1.000000e+00 : f32
    %131 = vector.broadcast %cst_42 : f32 to vector<32x64xf32>
    %132 = arith.select %129, %130, %131 : vector<32x64xi1>, vector<32x64xf32>
    %c4_i32_43 = arith.constant 4 : i32
    %133 = vector.broadcast %c4_i32_43 : i32 to vector<32x64xi32>
    %134 = arith.cmpi sge, %52, %133 : vector<32x64xi32>
    %c4_i32_44 = arith.constant 4 : i32
    %135 = tpu.dynamic_rotate %126 by %c4_i32_44 dim 0 : vector<32x64xf32>, i32 -> vector<32x64xf32>
    %cst_45 = arith.constant 0.000000e+00 : f32
    %136 = vector.broadcast %cst_45 : f32 to vector<32x64xf32>
    %137 = arith.select %134, %135, %136 : vector<32x64xi1>, vector<32x64xf32>
    %138 = arith.mulf %127, %137 : vector<32x64xf32>
    %139 = arith.addf %126, %138 : vector<32x64xf32>
    %140 = arith.mulf %127, %132 : vector<32x64xf32>
    %c8_i32 = arith.constant 8 : i32
    %141 = vector.broadcast %c8_i32 : i32 to vector<32x64xi32>
    %142 = arith.cmpi sge, %52, %141 : vector<32x64xi32>
    %c8_i32_46 = arith.constant 8 : i32
    %143 = tpu.dynamic_rotate %139 by %c8_i32_46 dim 0 : vector<32x64xf32>, i32 -> vector<32x64xf32>
    %cst_47 = arith.constant 0.000000e+00 : f32
    %144 = vector.broadcast %cst_47 : f32 to vector<32x64xf32>
    %145 = arith.select %142, %143, %144 : vector<32x64xi1>, vector<32x64xf32>
    %146 = arith.mulf %140, %145 : vector<32x64xf32>
    %147 = arith.addf %139, %146 : vector<32x64xf32>
    %148 = arith.negf %17 : vector<32x64xf32>
    %149 = math.exp %148 : vector<32x64xf32>
    %cst_48 = arith.constant 1.000000e+00 : f32
    %150 = vector.broadcast %cst_48 : f32 to vector<32x64xf32>
    %151 = arith.addf %150, %149 : vector<32x64xf32>
    %152 = arith.divf %150, %151 : vector<32x64xf32>
    %153 = arith.mulf %17, %152 : vector<32x64xf32>
    %154 = arith.mulf %153, %147 : vector<32x64xf32>
    %c0_49 = arith.constant 0 : index
    %c0_50 = arith.constant 0 : index
    %155 = vector.load %arg4[%c0_49, %c0_50] : memref<64x64xf32, #tpu.memory_space<vmem>>, vector<64x64xf32>
    %cst_51 = arith.constant dense<0.000000e+00> : vector<32x64xf32>
    %156 = tpu.matmul %154, %155, %cst_51 {dimension_numbers = #tpu.dot_dimension_numbers<[1], [0], [0], [1], [0, 0, 1, 1], [], []>} : vector<32x64xf32>, vector<64x64xf32>, vector<32x64xf32> -> vector<32x64xf32>
    %157 = arith.addf %0, %156 : vector<32x64xf32>
    %c0_52 = arith.constant 0 : index
    %c0_53 = arith.constant 0 : index
    %158 = vector.load %arg6[%c0_52, %c0_53] : memref<32x64xf32, #tpu.memory_space<vmem>>, vector<32x64xf32>
    tpu.vector_store %arg6[%c0_52, %c0_53], %157 {strides = array<i32>} : memref<32x64xf32, #tpu.memory_space<vmem>>, vector<32x64xf32>,
    return
  }
  func.func @transform_0(%arg0: i32) -> (i32, i32) {
    %c0_i32 = arith.constant 0 : i32
    %c0_i32_0 = arith.constant 0 : i32
    %c0_i32_1 = arith.constant 0 : i32
    return %c0_i32, %c0_i32_0 : i32, i32
  }
  func.func @transform_1(%arg0: i32) -> (i32, i32) {
    %c0_i32 = arith.constant 0 : i32
    %c0_i32_0 = arith.constant 0 : i32
    %c0_i32_1 = arith.constant 0 : i32
    return %c0_i32, %c0_i32_0 : i32, i32
  }
  func.func @transform_2(%arg0: i32) -> (i32, i32) {
    %c0_i32 = arith.constant 0 : i32
    %c0_i32_0 = arith.constant 0 : i32
    %c0_i32_1 = arith.constant 0 : i32
    return %c0_i32, %c0_i32_0 : i32, i32
  }
  func.func @transform_3(%arg0: i32) -> (i32, i32) {
    %c0_i32 = arith.constant 0 : i32
    %c0_i32_0 = arith.constant 0 : i32
    %c0_i32_1 = arith.constant 0 : i32
    return %c0_i32, %c0_i32_0 : i32, i32
  }
  func.func @transform_4(%arg0: i32) -> (i32, i32) {
    %c0_i32 = arith.constant 0 : i32
    %c0_i32_0 = arith.constant 0 : i32
    %c0_i32_1 = arith.constant 0 : i32
    return %c0_i32, %c0_i32_0 : i32, i32
  }
  func.func @transform_5(%arg0: i32) -> (i32, i32) {
    %c0_i32 = arith.constant 0 : i32
    %c0_i32_0 = arith.constant 0 : i32
    %c0_i32_1 = arith.constant 0 : i32
    return %c0_i32, %c0_i32_0 : i32, i32
  }
}

</mosaic_0001>

<bundles_post_ra>
// kernel: lstm_block_forward.1
= control target key start
LH: loop header
LB: loop body
LE: loop exit
PB: predicated region body
PF: predicated region fallthrough
CT: control target
= control target key end

     0   :  { %vm29_vm0 = vcmask 523264   ;;  %s1510_s0 = inlined_call_operand.vmem [shape: f32[32,64], index: 0, kind: input, shape index: {}]   ;;  %s1511_s1 = inlined_call_operand.vmem [shape: f32[1,64], index: 1, kind: input, shape index: {}]   ;;  %s1512_s2 = inlined_call_operand.vmem [shape: f32[64,256], index: 2, kind: input, shape index: {}]   ;;  %s1513_s3 = inlined_call_operand.vmem [shape: f32[64,64], index: 3, kind: input, shape index: {}]   ;;  %s1514_s4 = inlined_call_operand.vmem [shape: f32[4,128], index: 4, kind: input, shape index: {}]   ;;  %s1515_s5 = inlined_call_operand.hbm [shape: f32[32,64], index: 5, kind: output, shape index: {}]  }
   0x1   :  { %v1060_v0 = vld [vmem:[%s1510_s0 + $0x18] sm:$0xff]  ;;  %v1065_v1 = vld [vmem:[%s1510_s0 + $0x8] sm:$0xff] }
   0x2   :  { %v28_v2 = vmul.f32 %v1060_v0, %v1060_v0  ;;  %v26_v3 = vmul.f32 %v1065_v1, %v1065_v1 }
   0x3   :  { %10 = vsyncpa [#allocation3], 0  ;;  %v1074_v4 = vld [vmem:[%s1510_s0 + $0x10] sm:$0xff]  ;;  %v1079_v5 = vld [vmem:[%s1510_s0] sm:$0xff]  ;;  %v1022_v12 = vmov 64.0   ;;  %s1024_s6 = smov [#allocation2]  }
   0x4   :  { %v39_v6 = vsel %vm29_vm0, %v28_v2, 0.0  ;;  %v33_v7 = vsel %vm29_vm0, %v26_v3, 0.0  ;;  %v27_v8 = vmul.f32 %v1074_v4, %v1074_v4  ;;  %v25_v9 = vmul.f32 %v1079_v5, %v1079_v5  ;;  %v123_v14 = vld [vmem:[%s1512_s2 + $0x70] sm:$0xff]  ;;  %v121_v16 = vld [vmem:[%s1512_s2 + $0x60] sm:$0xff]  ;;  %v124_v21 = vld [vmem:[%s1512_s2 + $0x78] sm:$0xff]  ;;  %s894_s7 = sshll.u32 %s1024_s6, 4  ;;  %s895_s7 = int_to_ptr.vmem [resolvable:$true] %s894_s7 }
   0x5   :  { %40 = vadd.xlane.f32.xlu1 %v39_v6  ;;  %34 = vadd.xlane.f32.xlu0 %v33_v7  ;;  %942 = vrcp.f32 %v1022_v12  ;;  %v119_v17 = vld [vmem:[%s1512_s2 + $0x50] sm:$0xff]  ;;  %v117_v19 = vld [vmem:[%s1512_s2 + $0x40] sm:$0xff]  ;;  %v122_v24 = vld [vmem:[%s1512_s2 + $0x68] sm:$0xff]  ;;  %s1025_s10 = smov 128   ;;  %s1026_s11 = smov 8  }
   0x6   :  { %v36_v10 = vsel %vm29_vm0, %v27_v8, 0.0  ;;  %v30_v11 = vsel %vm29_vm0, %v25_v9, 0.0  ;;  %928 = vmatpush.msra.mxu3 %v123_v14  ;;  %145 = vmatpush.msra.mxu0 %v123_v14  ;;  %v115_v20 = vld [vmem:[%s1512_s2 + $0x30] sm:$0xff]  ;;  %v113_v23 = vld [vmem:[%s1512_s2 + $0x20] sm:$0xff]  ;;  %v120_v26 = vld [vmem:[%s1512_s2 + $0x58] sm:$0xff] }
   0x7   :  { %174 = vmatpush.msra.mxu1 %v124_v21  ;;  %v111_v25 = vld [vmem:[%s1512_s2 + $0x10] sm:$0xff]  ;;  %v109_v28 = vld [vmem:[%s1512_s2] sm:$0xff]  ;;  %v118_v29 = vld [vmem:[%s1512_s2 + $0x48] sm:$0xff] }
   0x8   :  { %929 = vmatpush.msra.mxu3 %v121_v16  ;;  %146 = vmatpush.msra.mxu0 %v121_v16  ;;  %v116_v30 = vld [vmem:[%s1512_s2 + $0x38] sm:$0xff]  ;;  %v114_v31 = vld [vmem:[%s1512_s2 + $0x28] sm:$0xff]  ;;  %v941_v61 = vld [vmem:[%s1511_s1] ss:$0 sm:$0xff]  ;;  %s896_s1 = sshll.u32 %s1515_s5, 4  ;;  %s897_s1 = int_to_ptr.hbm [resolvable:$true] %s896_s1 }
   0x9   :  { %175 = vmatpush.msra.mxu1 %v122_v24  ;;  %v112_v33 = vld [vmem:[%s1512_s2 + $0x18] sm:$0xff]  ;;  %v110_v36 = vld [vmem:[%s1512_s2 + $0x8] sm:$0xff] }
   0xa   :  { %930 = vmatpush.msra.mxu3 %v119_v17  ;;  %147 = vmatpush.msra.mxu0 %v119_v17 }
   0xb   :  { %v943_v13 = vpop.eup %942  ;;  %176 = vmatpush.msra.mxu1 %v120_v26 }
   0xc   :  { %v43_v15 = vmul.f32 64.0, %v943_v13  ;;  %931 = vmatpush.msra.mxu3 %v117_v19  ;;  %148 = vmatpush.msra.mxu0 %v117_v19  ;;  %vm47_vm1 = vweird.f32 %v943_v13 }
   0xd   :  { %37 = vadd.xlane.f32.xlu0 %v36_v10  ;;  %31 = vadd.xlane.f32.xlu1 %v30_v11 }
   0xe   :  { %v44_v18 = vsub.f32 1.0, %v43_v15  ;;  %932 = vmatpush.msra.mxu3 %v115_v20  ;;  %149 = vmatpush.msra.mxu0 %v115_v20 }
   0xf   :  { %177 = vmatpush.msra.mxu1 %v118_v29 }
  0x10   :  { %v45_v22 = vmul.f32 %v943_v13, %v44_v18  ;;  %933 = vmatpush.msra.mxu3 %v113_v23  ;;  %150 = vmatpush.msra.mxu0 %v113_v23 }
  0x11   :  { %178 = vmatpush.msra.mxu1 %v116_v30 }
  0x12   :  { %934 = vmatpush.msra.mxu3 %v111_v25  ;;  %v46_v27 = vadd.f32 %v943_v13, %v45_v22  ;;  %151 = vmatpush.msra.mxu0 %v111_v25 }
  0x13   :  { %179 = vmatpush.msra.mxu1 %v114_v31 }
  0x14   :  { %935 = vmatpush.msra.mxu3 %v109_v28  ;;  %152 = vmatpush.msra.mxu0 %v109_v28  ;;  %v48_v32 = vsel %vm47_vm1, %v943_v13, %v46_v27 }
  0x15   :  { %180 = vmatpush.msra.mxu1 %v112_v33 }
  0x17   :  { %181 = vmatpush.msra.mxu1 %v110_v36 }
  0x78   :  { %v41_v34 = vpop.xlane.xlu1 %40  ;;  %v35_v35 = vpop.xlane.xlu0 %34 }
  0x79   :  { %v52_v37 = vmul.f32 %v48_v32, %v41_v34  ;;  %v50_v38 = vmul.f32 %v48_v32, %v35_v35 }
  0x7b   :  { %v56_v39 = vadd.f32 1e-05, %v52_v37  ;;  %v54_v40 = vadd.f32 1e-05, %v50_v38 }
  0x7d   :  { %944 = vrsqrt.f32 %v56_v39  ;;  %vm73_vm3 = vweird.f32 %v54_v40  ;;  %vm93_vm10 = vweird.f32 %v56_v39 }
  0x7e   :  { %946 = vrsqrt.f32 %v54_v40 }
  0x80   :  { %v38_v41 = vpop.xlane.xlu0 %37  ;;  %v32_v42 = vpop.xlane.xlu1 %31 }
  0x81   :  { %v51_v43 = vmul.f32 %v48_v32, %v38_v41  ;;  %v49_v44 = vmul.f32 %v48_v32, %v32_v42 }
  0x83   :  { %v945_v45 = vpop.eup %944  ;;  %v55_v46 = vadd.f32 1e-05, %v51_v43  ;;  %v53_v47 = vadd.f32 1e-05, %v49_v44 }
  0x84   :  { %v947_v48 = vpop.eup %946  ;;  %v88_v50 = vmul.f32 %v945_v45, %v56_v39  ;;  %vm94_vm11 = vweird.f32 %v945_v45 }
  0x85   :  { %v68_v49 = vmul.f32 %v947_v48, %v54_v40  ;;  %948 = vrsqrt.f32 %v55_v46  ;;  %vm74_vm2 = vweird.f32 %v947_v48  ;;  %vm63_vm5 = vweird.f32 %v53_v47  ;;  %vm95_vm13 = vmor %vm93_vm10, %vm94_vm11 }
  0x86   :  { %950 = vrsqrt.f32 %v53_v47  ;;  %v89_v54 = vmul.f32 %v945_v45, %v88_v50  ;;  %vm75_vm4 = vmor %vm73_vm3, %vm74_vm2  ;;  %vm83_vm8 = vweird.f32 %v55_v46 }
  0x87   :  { %v69_v51 = vmul.f32 %v947_v48, %v68_v49 }
  0x88   :  { %v90_v62 = vmul.f32 0.5, %v89_v54 }
  0x89   :  { %v70_v52 = vmul.f32 0.5, %v69_v51 }
  0x8a   :  { %v91_v10 = vsub.f32 1.5, %v90_v62 }
  0x8b   :  { %v949_v53 = vpop.eup %948  ;;  %v71_v55 = vsub.f32 1.5, %v70_v52 }
  0x8c   :  { %v951_v56 = vpop.eup %950  ;;  %v78_v57 = vmul.f32 %v949_v53, %v55_v46  ;;  %vm84_vm7 = vweird.f32 %v949_v53  ;;  %v92_v15 = vmul.f32 %v945_v45, %v91_v10 }
  0x8d   :  { %v72_v58 = vmul.f32 %v947_v48, %v71_v55  ;;  %v58_v59 = vmul.f32 %v951_v56, %v53_v47  ;;  %vm64_vm6 = vweird.f32 %v951_v56  ;;  %vm85_vm12 = vmor %vm83_vm8, %vm84_vm7 }
  0x8e   :  { %v79_v60 = vmul.f32 %v949_v53, %v78_v57  ;;  %vm65_vm9 = vmor %vm63_vm5, %vm64_vm6  ;;  %v96_v20 = vsel %vm95_vm13, %v945_v45, %v92_v15 }
  0x8f   :  { %v59_v63 = vmul.f32 %v951_v56, %v58_v59  ;;  %v76_v2 = vsel %vm75_vm4, %v947_v48, %v72_v58  ;;  %v100_v21 = vmul.f32 %v96_v20, %v1060_v0 }
  0x90   :  { %v80_v3 = vmul.f32 0.5, %v79_v60  ;;  %v98_v6 = vmul.f32 %v76_v2, %v1065_v1 }
  0x91   :  { %v60_v7 = vmul.f32 0.5, %v59_v63  ;;  %v108_v22 = vmul.f32 %v941_v61, %v100_v21 }
  0x92   :  { %v81_v8 = vsub.f32 1.5, %v80_v3  ;;  %v106_v9 = vmul.f32 %v941_v61, %v98_v6 }
  0x93   :  { %v61_v11 = vsub.f32 1.5, %v60_v7 }
  0x94   :  { %v82_v12 = vmul.f32 %v949_v53, %v81_v8  ;;  %909 = vmatmul.msk.f32.vlgmr.msra.gmra.mxu3 %vm29_vm0, %v106_v9 }
  0x95   :  { %v62_v13 = vmul.f32 %v951_v56, %v61_v11 }
  0x96   :  { %v86_v14 = vsel %vm85_vm12, %v949_v53, %v82_v12 }
  0x97   :  { %v66_v1 = vsel %vm65_vm9, %v951_v56, %v62_v13  ;;  %v99_v16 = vmul.f32 %v86_v14, %v1074_v4  ;;  %v195_v4 = vlaneseq }
  0x98   :  { %v97_v17 = vmul.f32 %v66_v1, %v1079_v5  ;;  %v248_v5 = vld [vmem:[%s1514_s4] sm:$0xf]  ;;  %s1023_s4 = smov 64  }
  0x99   :  { %v107_v18 = vmul.f32 %v941_v61, %v99_v16  ;;  %v1155_v23 = vshrl.u32 %v195_v4, 7  ;;  %v249_v0 = vperm.slane %v248_v5, 3  ;;  %v271_v28 = vperm.slane %v248_v5, 2 }
  0x9a   :  { %v105_v19 = vmul.f32 %v941_v61, %v97_v17  ;;  %v297_v33 = vperm.slane %v248_v5, 1  ;;  %v323_v40 = vperm.slane %v248_v5, 0 }
  0x9b   :  { %v198_v25 = vadd.s32 16, %v1155_v23  ;;  %vm258_vm14 = vcmp.lt.s32.totalorder %v1155_v23, 1  ;;  %vm284_vm15 = vcmp.lt.s32.totalorder %v1155_v23, 2  ;;  %vm310_vm1 = vcmp.lt.s32.totalorder %v1155_v23, 3 }
  0x9c   :  { %908 = vmatmul.msk.f32.vlgmr.msra.gmra.mxu0 %vm29_vm0, %v105_v19  ;;  %910 = vmatmul.msk.f32.gmra.mxu3 %vm29_vm0, %v107_v18  ;;  %v1190_v56 = vand.u32 15, %v1155_v23 }
  0x9d   :  { %912 = vmatmul.msk.f32.vlgmr.msra.gmra.mxu1 %vm29_vm0, %v105_v19  ;;  %v1166_v34 = vand.u32 15, %v198_v25 }
  0x9e   :  { %vm263_vm5 = vcmp.ge.s32.totalorder %v1190_v56, 1  ;;  %vm289_vm6 = vcmp.ge.s32.totalorder %v1190_v56, 2  ;;  %vm315_vm7 = vcmp.ge.s32.totalorder %v1190_v56, 3 }
  0x9f   :  { %vm265_vm2 = vcmp.ge.s32.totalorder %v1166_v34, 1  ;;  %vm291_vm3 = vcmp.ge.s32.totalorder %v1166_v34, 2  ;;  %vm317_vm4 = vcmp.ge.s32.totalorder %v1166_v34, 3 }
  0xa4   :  { %911 = vmatmul.msk.f32.gmra.mxu3 %vm29_vm0, %v108_v22 }
  0xa5   :  { %913 = vmatmul.msk.f32.gmra.mxu1 %vm29_vm0, %v106_v9 }
  0xad   :  { %914 = vmatmul.msk.f32.gmra.mxu1 %vm29_vm0, %v107_v18 }
  0xb5   :  { %915 = vmatmul.msk.f32.gmra.mxu1 %vm29_vm0, %v108_v22 }
 0x117   :  { %v157_v24 = vpop.f32.mrf.mxu3 }
 0x118   :  { %v255_v26 = vrot.slane %v157_v24, 7  ;;  %v281_v29 = vrot.slane %v157_v24, 6  ;;  %v307_v35 = vrot.slane %v157_v24, 5  ;;  %v251_v38 = vmul.f32 %v249_v0, %v157_v24 }
 0x119   :  { %v1158_v27 = vpop.f32.mrf.mxu0 }
 0x11a   :  { %v254_v30 = vrot.slane %v1158_v27, 7  ;;  %v280_v31 = vrot.slane %v1158_v27, 6  ;;  %v306_v32 = vrot.slane %v1158_v27, 5  ;;  %v250_v7 = vmul.f32 %v249_v0, %v1158_v27 }
 0x11c   :  { %v261_v36 = vsel %vm258_vm14, %v254_v30, %v255_v26  ;;  %v287_v37 = vsel %vm284_vm15, %v280_v31, %v281_v29  ;;  %v313_v41 = vsel %vm310_vm1, %v306_v32, %v307_v35 }
 0x11d   :  { %v273_v39 = vmul.f32 %v271_v28, %v261_v36  ;;  %v299_v43 = vmul.f32 %v297_v33, %v287_v37  ;;  %v325_v49 = vmul.f32 %v323_v40, %v313_v41 }
 0x11f   :  { %v277_v42 = vadd.f32 %v273_v39, %v251_v38  ;;  %v160_v44 = vpop.f32.mrf.mxu3 }
 0x120   :  { %v256_v45 = vrot.slane %v160_v44, 7  ;;  %v282_v46 = vrot.slane %v160_v44, 6  ;;  %v308_v47 = vrot.slane %v160_v44, 5  ;;  %v252_v57 = vmul.f32 %v249_v0, %v160_v44 }
 0x121   :  { %v303_v48 = vadd.f32 %v299_v43, %v277_v42 }
 0x122   :  { %v260_v50 = vsel %vm258_vm14, %v255_v26, %v256_v45  ;;  %v286_v51 = vsel %vm284_vm15, %v281_v29, %v282_v46  ;;  %v312_v52 = vsel %vm310_vm1, %v307_v35, %v308_v47 }
 0x123   :  { %v329_v53 = vadd.f32 %v325_v49, %v303_v48  ;;  %v269_v54 = vsel %vm265_vm2, %v260_v50, 0.0  ;;  %v295_v55 = vsel %vm291_vm3, %v286_v51, 0.0  ;;  %v321_v60 = vsel %vm317_vm4, %v312_v52, 0.0 }
 0x124   :  { %v274_v58 = vmul.f32 %v271_v28, %v269_v54  ;;  %v300_v62 = vmul.f32 %v297_v33, %v295_v55  ;;  %v326_v3 = vmul.f32 %v323_v40, %v321_v60 }
 0x125   :  { %v917_v59 = vmul.f32 -1.442695, %v329_v53 }
 0x126   :  { %v278_v61 = vadd.f32 %v274_v58, %v252_v57 }
 0x127   :  { %952 = vpow2.f32 %v917_v59  ;;  %v163_v63 = vpop.f32.mrf.mxu3 }
 0x128   :  { %v304_v2 = vadd.f32 %v300_v62, %v278_v61  ;;  %v257_v6 = vrot.slane %v163_v63, 7  ;;  %v283_v8 = vrot.slane %v163_v63, 6  ;;  %v309_v9 = vrot.slane %v163_v63, 5 }
 0x129   :  { %v253_v11 = vmul.f32 %v249_v0, %v163_v63 }
 0x12a   :  { %v330_v10 = vadd.f32 %v326_v3, %v304_v2  ;;  %v259_v12 = vsel %vm258_vm14, %v256_v45, %v257_v6  ;;  %v262_v13 = vsel %vm258_vm14, %v257_v6, %v254_v30  ;;  %v285_v1 = vsel %vm284_vm15, %v282_v46, %v283_v8 }
 0x12b   :  { %v267_v14 = vsel %vm263_vm5, %v262_v13, 0.0  ;;  %v275_v15 = vmul.f32 %v271_v28, %v259_v12  ;;  %v288_v16 = vsel %vm284_vm15, %v283_v8, %v280_v31  ;;  %v301_v20 = vmul.f32 %v297_v33, %v285_v1 }
 0x12c   :  { %v918_v17 = vmul.f32 -1.442695, %v330_v10  ;;  %v272_v18 = vmul.f32 %v271_v28, %v267_v14  ;;  %v293_v19 = vsel %vm289_vm6, %v288_v16, 0.0  ;;  %v311_v5 = vsel %vm310_vm1, %v308_v47, %v309_v9 }
 0x12d   :  { %v953_v21 = vpop.eup %952  ;;  %v279_v22 = vadd.f32 %v275_v15, %v253_v11  ;;  %v298_v4 = vmul.f32 %v297_v33, %v293_v19  ;;  %v314_v24 = vsel %vm310_vm1, %v309_v9, %v306_v32  ;;  %v327_v29 = vmul.f32 %v323_v40, %v311_v5 }
 0x12e   :  { %v345_v25 = vadd.f32 1.0, %v953_v21  ;;  %954 = vpow2.f32 %v918_v17  ;;  %v276_v0 = vadd.f32 %v272_v18, %v250_v7  ;;  %v319_v26 = vsel %vm315_vm7, %v314_v24, 0.0 }
 0x12f   :  { %v305_v28 = vadd.f32 %v301_v20, %v279_v22  ;;  %v324_v31 = vmul.f32 %v323_v40, %v319_v26 }
 0x130   :  { %956 = vrcp.f32 %v345_v25  ;;  %v302_v30 = vadd.f32 %v298_v4, %v276_v0  ;;  %v374_v42 = vand.u32 2147483648, %v345_v25  ;;  %v372_v45 = vand.u32 2147483647, %v345_v25 }
 0x131   :  { %v331_v33 = vadd.f32 %v327_v29, %v305_v28  ;;  %vm368_vm9 = vweird.f32 %v345_v25 }
 0x132   :  { %v328_v35 = vadd.f32 %v324_v31, %v302_v30  ;;  %v375_v50 = vor.u32 1.1754944e-38, %v374_v42  ;;  %vm373_vm11 = vcmp.eq.f32.partialorder %v372_v45, 8.507059e+37 }
 0x133   :  { %v919_v36 = vmul.f32 -1.442695, %v331_v33 }
 0x134   :  { %v955_v37 = vpop.eup %954  ;;  %v916_v38 = vmul.f32 -1.442695, %v328_v35 }
 0x135   :  { %v346_v27 = vadd.f32 1.0, %v955_v37  ;;  %958 = vpow2.f32 %v919_v36 }
 0x136   :  { %v957_v39 = vpop.eup %956  ;;  %960 = vpow2.f32 %v916_v38 }
 0x137   :  { %962 = vrcp.f32 %v346_v27  ;;  %v364_v32 = vmul.f32 %v957_v39, %v345_v25  ;;  %vm369_vm8 = vweird.f32 %v957_v39  ;;  %v389_v55 = vand.u32 2147483648, %v346_v27 }
 0x138   :  { %vm370_vm10 = vmor %vm368_vm9, %vm369_vm8  ;;  %v387_v59 = vand.u32 2147483647, %v346_v27  ;;  %vm383_vm13 = vweird.f32 %v346_v27 }
 0x139   :  { %v365_v41 = vsub.f32 1.0, %v364_v32  ;;  %v390_v2 = vor.u32 1.1754944e-38, %v389_v55 }
 0x13a   :  { %vm388_vm4 = vcmp.eq.f32.partialorder %v387_v59, 8.507059e+37 }
 0x13b   :  { %v959_v43 = vpop.eup %958  ;;  %v366_v44 = vmul.f32 %v957_v39, %v365_v41 }
 0x13c   :  { %v961_v46 = vpop.eup %960  ;;  %v347_v47 = vadd.f32 1.0, %v959_v43 }
 0x13d   :  { %v963_v40 = vpop.eup %962  ;;  %v344_v48 = vadd.f32 1.0, %v961_v46  ;;  %v367_v49 = vadd.f32 %v957_v39, %v366_v44 }
 0x13e   :  { %964 = vrcp.f32 %v347_v47  ;;  %v379_v52 = vmul.f32 %v963_v40, %v346_v27  ;;  %vm384_vm12 = vweird.f32 %v963_v40  ;;  %v404_v17 = vand.u32 2147483648, %v347_v47 }
 0x13f   :  { %966 = vrcp.f32 %v344_v48  ;;  %v371_v51 = vsel %vm370_vm10, %v957_v39, %v367_v49  ;;  %vm385_vm1 = vmor %vm383_vm13, %vm384_vm12  ;;  %v359_v9 = vand.u32 2147483648, %v344_v48  ;;  %v357_v11 = vand.u32 2147483647, %v344_v48 }
 0x140   :  { %v1216_v53 = vsel %vm373_vm11, %v375_v50, %v371_v51  ;;  %v380_v54 = vsub.f32 1.0, %v379_v52  ;;  %vm353_vm8 = vweird.f32 %v344_v48  ;;  %vm398_vm12 = vweird.f32 %v347_v47 }
 0x141   :  { %414 = vrot.lane.b32.xlu0 %v1216_v53, %s1023_s4  ;;  %v360_v14 = vor.u32 1.1754944e-38, %v359_v9  ;;  %vm358_vm10 = vcmp.eq.f32.partialorder %v357_v11, 8.507059e+37  ;;  %v402_v18 = vand.u32 2147483647, %v347_v47  ;;  %v405_v20 = vor.u32 1.1754944e-38, %v404_v17 }
 0x142   :  { %v381_v58 = vmul.f32 %v963_v40, %v380_v54 }
 0x144   :  { %v965_v57 = vpop.eup %964  ;;  %v382_v62 = vadd.f32 %v963_v40, %v381_v58 }
 0x145   :  { %v967_v60 = vpop.eup %966  ;;  %v394_v61 = vmul.f32 %v965_v57, %v347_v47  ;;  %vm399_vm11 = vweird.f32 %v965_v57 }
 0x146   :  { %v349_v63 = vmul.f32 %v967_v60, %v344_v48  ;;  %v386_v6 = vsel %vm385_vm1, %v963_v40, %v382_v62  ;;  %vm354_vm7 = vweird.f32 %v967_v60  ;;  %vm400_vm13 = vmor %vm398_vm12, %vm399_vm11  ;;  %vm403_vm1 = vcmp.eq.f32.partialorder %v402_v18, 8.507059e+37 }
 0x147   :  { %v395_v3 = vsub.f32 1.0, %v394_v61  ;;  %v1220_v8 = vsel %vm388_vm4, %v390_v2, %v386_v6  ;;  %vm355_vm9 = vmor %vm353_vm8, %vm354_vm7  ;;  %vm620_vm4 = vcmp.lt.s32.totalorder %v1155_v23, 4  ;;  %v840_v23 = vld [vmem:[%s1513_s3 + $0x38] sm:$0xff] }
 0x148   :  { %v350_v7 = vsub.f32 1.0, %v349_v63  ;;  %416 = vrot.lane.b32.xlu1 %v1220_v8, %s1023_s4  ;;  %861 = vmatpush.msra.mxu2 %v840_v23 }
 0x149   :  { %v396_v12 = vmul.f32 %v965_v57, %v395_v3 }
 0x14a   :  { %v351_v10 = vmul.f32 %v967_v60, %v350_v7 }
 0x14b   :  { %v397_v16 = vadd.f32 %v965_v57, %v396_v12 }
 0x14c   :  { %v352_v13 = vadd.f32 %v967_v60, %v351_v10 }
 0x14d   :  { %v401_v19 = vsel %vm400_vm13, %v965_v57, %v397_v16 }
 0x14e   :  { %v356_v15 = vsel %vm355_vm9, %v967_v60, %v352_v13  ;;  %v1228_v21 = vsel %vm403_vm1, %v405_v20, %v401_v19 }
 0x14f   :  { %v1224_v1 = vsel %vm358_vm10, %v360_v14, %v356_v15 }
 0x150   :  { %412 = vrot.lane.b32.xlu2 %v1224_v1, %s1023_s4 }
 0x158   :  { %418 = vrot.lane.b32.xlu2 %v1228_v21, %s1023_s4 }
 0x1aa   :  { %v413_v22 = vpop.permute.xlu2 %412 }
 0x1ab   :  { %v424_v4 = vadd.f32 %v413_v22, %v1224_v1 }
 0x1ad   :  { %v428_v5 = vadd.f32 0.0001, %v424_v4 }
 0x1af   :  { %968 = vrcp.f32 %v428_v5 }
 0x1b2   :  { %v419_v24 = vpop.permute.xlu2 %418 }
 0x1b3   :  { %v427_v25 = vadd.f32 %v419_v24, %v1228_v21  ;;  %v415_v0 = vpop.permute.xlu0 %414 }
 0x1b4   :  { %v425_v26 = vadd.f32 %v415_v0, %v1216_v53 }
 0x1b5   :  { %v969_v28 = vpop.eup %968  ;;  %v431_v29 = vadd.f32 0.0001, %v427_v25 }
 0x1b6   :  { %v436_v30 = vmul.f32 %v969_v28, %v428_v5  ;;  %v429_v31 = vadd.f32 0.0001, %v425_v26 }
 0x1b7   :  { %970 = vrcp.f32 %v431_v29 }
 0x1b8   :  { %972 = vrcp.f32 %v429_v31  ;;  %v440_v33 = vsub.f32 2.0, %v436_v30  ;;  %v1329_v30 = vpop.f32.mrf.mxu1 }
 0x1ba   :  { %v417_v35 = vpop.permute.xlu1 %416  ;;  %v444_v39 = vmul.f32 %v969_v28, %v440_v33 }
 0x1bb   :  { %v426_v37 = vadd.f32 %v417_v35, %v1220_v8 }
 0x1bc   :  { %v1237_v45 = vmul.f32 %v444_v39, %v1224_v1 }
 0x1bd   :  { %v971_v36 = vpop.eup %970  ;;  %v430_v41 = vadd.f32 0.0001, %v426_v37 }
 0x1be   :  { %v973_v38 = vpop.eup %972  ;;  %v439_v27 = vmul.f32 %v971_v36, %v431_v29  ;;  %v476_v49 = vrot.slane %v1237_v45, 7 }
 0x1bf   :  { %v437_v32 = vmul.f32 %v973_v38, %v429_v31  ;;  %974 = vrcp.f32 %v430_v41 }
 0x1c0   :  { %v443_v42 = vsub.f32 2.0, %v439_v27  ;;  %v1331_v31 = vpop.f32.mrf.mxu1  ;;  %v452_v27 = vmul.f32 %v1224_v1, %v1329_v30 }
 0x1c1   :  { %v441_v43 = vsub.f32 2.0, %v437_v32 }
 0x1c2   :  { %v447_v44 = vmul.f32 %v971_v36, %v443_v42 }
 0x1c3   :  { %v445_v46 = vmul.f32 %v973_v38, %v441_v43 }
 0x1c4   :  { %466 = vrot.lane.b32.xlu2 %v447_v44, %s1023_s4  ;;  %v1241_v47 = vmul.f32 %v447_v44, %v1228_v21 }
 0x1c5   :  { %v1244_v40 = vmul.f32 %v445_v46, %v1216_v53  ;;  %v975_v50 = vpop.eup %974 }
 0x1c6   :  { %v479_v48 = vrot.slane %v1241_v47, 7  ;;  %v438_v52 = vmul.f32 %v975_v50, %v430_v41  ;;  %v453_v41 = vmul.f32 %v1216_v53, %v1331_v31 }
 0x1c7   :  { %v477_v51 = vrot.slane %v1244_v40, 7 }
 0x1c8   :  { %v483_v54 = vsel %vm258_vm14, %v479_v48, %v476_v49  ;;  %v442_v58 = vsub.f32 2.0, %v438_v52  ;;  %v1333_v33 = vpop.f32.mrf.mxu1 }
 0x1c9   :  { %v484_v55 = vsel %vm263_vm5, %v483_v54, 1.0  ;;  %v482_v57 = vsel %vm258_vm14, %v476_v49, %v477_v51 }
 0x1ca   :  { %v446_v59 = vmul.f32 %v975_v50, %v442_v58  ;;  %v1257_v60 = vmul.f32 %v484_v55, %v1237_v45  ;;  %v1260_v61 = vmul.f32 %v482_v57, %v1244_v40 }
 0x1cc   :  { %460 = vrot.lane.b32.xlu2 %v444_v39, %s1023_s4  ;;  %464 = vrot.lane.b32.xlu0 %v446_v59, %s1023_s4  ;;  %v1264_v62 = vmul.f32 %v446_v59, %v1220_v8  ;;  %v544_v2 = vrot.slane %v1257_v60, 6  ;;  %v545_v3 = vrot.slane %v1260_v61, 6 }
 0x1ce   :  { %v478_v63 = vrot.slane %v1264_v62, 7  ;;  %v550_v11 = vsel %vm284_vm15, %v544_v2, %v545_v3 }
 0x1cf   :  { %v1287_v15 = vmul.f32 %v550_v11, %v1260_v61 }
 0x1d0   :  { %v480_v6 = vsel %vm258_vm14, %v478_v63, %v479_v48  ;;  %v481_v7 = vsel %vm258_vm14, %v477_v51, %v478_v63  ;;  %v1335_v35 = vpop.f32.mrf.mxu1 }
 0x1d1   :  { %v1274_v9 = vmul.f32 %v480_v6, %v1241_v47  ;;  %v486_v10 = vsel %vm265_vm2, %v481_v7, 1.0  ;;  %v617_v0 = vrot.slane %v1287_v15, 4  ;;  %v455_v36 = vmul.f32 %v1228_v21, %v1335_v35 }
 0x1d2   :  { %v1282_v12 = vmul.f32 %v486_v10, %v1264_v62  ;;  %v454_v21 = vmul.f32 %v1220_v8, %v1333_v33 }
 0x1d3   :  { %v547_v13 = vrot.slane %v1274_v9, 6 }
 0x1d4   :  { %462 = vrot.lane.b32.xlu2 %v445_v46, %s1023_s4  ;;  %v546_v14 = vrot.slane %v1282_v12, 6 }
 0x1d5   :  { %v551_v16 = vsel %vm284_vm15, %v547_v13, %v544_v2 }
 0x1d6   :  { %v552_v17 = vsel %vm289_vm6, %v551_v16, 1.0  ;;  %v549_v18 = vsel %vm284_vm15, %v545_v3, %v546_v14  ;;  %v548_v19 = vsel %vm284_vm15, %v546_v14, %v547_v13 }
 0x1d7   :  { %v1298_v20 = vmul.f32 %v552_v17, %v1257_v60  ;;  %v554_v22 = vsel %vm291_vm3, %v549_v18, 1.0  ;;  %v1303_v4 = vmul.f32 %v548_v19, %v1274_v9 }
 0x1d8   :  { %v1307_v5 = vmul.f32 %v554_v22, %v1282_v12 }
 0x1d9   :  { %v616_v24 = vrot.slane %v1298_v20, 4  ;;  %v619_v25 = vrot.slane %v1303_v4, 4 }
 0x1da   :  { %v618_v26 = vrot.slane %v1307_v5, 4 }
 0x1db   :  { %v1319_v28 = vsel %vm620_vm4, %v616_v24, %v617_v0 }
 0x1dc   :  { %v1327_v29 = vsel %vm620_vm4, %v618_v26, %v619_v25 }
 0x21e   :  { %v467_v37 = vpop.permute.xlu2 %466 }
 0x21f   :  { %v475_v38 = vmul.f32 %v467_v37, %v455_v36 }
 0x221   :  { %498 = vrot.lane.b32.xlu1 %v475_v38, %s1023_s4 }
 0x226   :  { %v461_v39 = vpop.permute.xlu2 %460 }
 0x227   :  { %v472_v32 = vmul.f32 %v461_v39, %v452_v27 }
 0x229   :  { %492 = vrot.lane.b32.xlu2 %v472_v32, %s1023_s4 }
 0x22e   :  { %v463_v42 = vpop.permute.xlu2 %462 }
 0x22f   :  { %v473_v43 = vmul.f32 %v463_v42, %v453_v41 }
 0x231   :  { %494 = vrot.lane.b32.xlu0 %v473_v43, %s1023_s4 }
 0x23e   :  { %v465_v44 = vpop.permute.xlu0 %464 }
 0x23f   :  { %v474_v46 = vmul.f32 %v465_v44, %v454_v21 }
 0x241   :  { %496 = vrot.lane.b32.xlu2 %v474_v46, %s1023_s4 }
 0x283   :  { %v493_v48 = vpop.permute.xlu2 %492 }
 0x284   :  { %v504_v49 = vrot.slane %v493_v48, 7 }
 0x293   :  { %v499_v1 = vpop.permute.xlu1 %498 }
 0x294   :  { %v507_v50 = vrot.slane %v499_v1, 7 }
 0x296   :  { %v511_v51 = vsel %vm258_vm14, %v507_v50, %v504_v49 }
 0x297   :  { %v512_v53 = vsel %vm263_vm5, %v511_v51, 0.0 }
 0x298   :  { %v516_v52 = vmul.f32 %v512_v53, %v1237_v45 }
 0x29a   :  { %524 = vrot.lane.b32.xlu1 %v516_v52, %s1023_s4 }
 0x29b   :  { %v497_v54 = vpop.permute.xlu2 %496 }
 0x29c   :  { %v506_v8 = vrot.slane %v497_v54, 7 }
 0x29e   :  { %v508_v55 = vsel %vm258_vm14, %v506_v8, %v507_v50 }
 0x29f   :  { %v519_v57 = vmul.f32 %v508_v55, %v1241_v47 }
 0x2a1   :  { %530 = vrot.lane.b32.xlu0 %v519_v57, %s1023_s4 }
 0x2a3   :  { %v495_v58 = vpop.permute.xlu0 %494 }
 0x2a4   :  { %v505_v59 = vrot.slane %v495_v58, 7 }
 0x2a6   :  { %v509_v63 = vsel %vm258_vm14, %v505_v59, %v506_v8  ;;  %v510_v2 = vsel %vm258_vm14, %v504_v49, %v505_v59  ;;  %vm612_vm14 = vcmp.ge.s32.totalorder %v1190_v56, 4 }
 0x2a7   :  { %v517_v45 = vmul.f32 %v510_v2, %v1244_v40  ;;  %v514_v3 = vsel %vm265_vm2, %v509_v63, 0.0 }
 0x2a8   :  { %v518_v6 = vmul.f32 %v514_v3, %v1264_v62  ;;  %v624_v3 = vsel %vm620_vm4, %v619_v25, %v616_v24  ;;  %v622_v24 = vsel %vm620_vm4, %v617_v0, %v618_v26  ;;  %v837_v0 = vld [vmem:[%s1513_s3 + $0x20] sm:$0xff]  ;;  %v836_v26 = vld [vmem:[%s1513_s3 + $0x18] sm:$0xff] }
 0x2a9   :  { %526 = vrot.lane.b32.xlu1 %v517_v45, %s1023_s4 }
 0x2aa   :  { %528 = vrot.lane.b32.xlu2 %v518_v6, %s1023_s4 }
 0x304   :  { %v529_v47 = vpop.permute.xlu2 %528 }
 0x305   :  { %v538_v7 = vadd.f32 %v529_v47, %v474_v46 }
 0x307   :  { %564 = vrot.lane.b32.xlu1 %v538_v7, %s1023_s4 }
 0x30c   :  { %v525_v10 = vpop.permute.xlu1 %524 }
 0x30d   :  { %v536_v11 = vadd.f32 %v525_v10, %v472_v32 }
 0x30f   :  { %560 = vrot.lane.b32.xlu0 %v536_v11, %s1023_s4 }
 0x313   :  { %v531_v13 = vpop.permute.xlu0 %530 }
 0x314   :  { %v539_v14 = vadd.f32 %v531_v13, %v475_v38 }
 0x316   :  { %566 = vrot.lane.b32.xlu2 %v539_v14, %s1023_s4 }
 0x31b   :  { %v527_v40 = vpop.permute.xlu1 %526 }
 0x31c   :  { %v537_v16 = vadd.f32 %v527_v40, %v473_v43 }
 0x31e   :  { %562 = vrot.lane.b32.xlu0 %v537_v16, %s1023_s4 }
 0x370   :  { %v567_v62 = vpop.permute.xlu2 %566 }
 0x371   :  { %v575_v18 = vrot.slane %v567_v62, 6 }
 0x379   :  { %v565_v17 = vpop.permute.xlu1 %564 }
 0x37a   :  { %v574_v19 = vrot.slane %v565_v17, 6  ;;  %v835_v17 = vld [vmem:[%s1513_s3 + $0x10] sm:$0xff] }
 0x37c   :  { %v576_v22 = vsel %vm284_vm15, %v574_v19, %v575_v18 }
 0x37d   :  { %v587_v36 = vmul.f32 %v576_v22, %v1274_v9 }
 0x37f   :  { %598 = vrot.lane.b32.xlu1 %v587_v36, %s1023_s4 }
 0x381   :  { %v561_v37 = vpop.permute.xlu0 %560 }
 0x382   :  { %v572_v27 = vrot.slane %v561_v37, 6 }
 0x384   :  { %v579_v38 = vsel %vm284_vm15, %v575_v18, %v572_v27 }
 0x385   :  { %v580_v39 = vsel %vm289_vm6, %v579_v38, 0.0  ;;  %v920_v38 = vmul.f32 -1.442695, %v1329_v30 }
 0x386   :  { %v584_v32 = vmul.f32 %v580_v39, %v1257_v60 }
 0x387   :  { %976 = vpow2.f32 %v920_v38 }
 0x388   :  { %592 = vrot.lane.b32.xlu2 %v584_v32, %s1023_s4 }
 0x38d   :  { %v977_v39 = vpop.eup %976 }
 0x38e   :  { %v745_v32 = vadd.f32 1.0, %v977_v39 }
 0x390   :  { %v563_v41 = vpop.permute.xlu0 %562  ;;  %978 = vrcp.f32 %v745_v32 }
 0x391   :  { %v573_v42 = vrot.slane %v563_v41, 6  ;;  %v834_v41 = vld [vmem:[%s1513_s3 + $0x8] sm:$0xff] }
 0x393   :  { %v577_v43 = vsel %vm284_vm15, %v573_v42, %v574_v19  ;;  %v578_v9 = vsel %vm284_vm15, %v572_v27, %v573_v42  ;;  %vm614_vm15 = vcmp.ge.s32.totalorder %v1166_v34, 4  ;;  %v839_v34 = vld [vmem:[%s1513_s3 + $0x30] sm:$0xff]  ;;  %v833_v42 = vld [vmem:[%s1513_s3] sm:$0xff] }
 0x394   :  { %v585_v21 = vmul.f32 %v578_v9, %v1260_v61  ;;  %v582_v44 = vsel %vm291_vm3, %v577_v43, 0.0  ;;  %862 = vmatpush.msra.mxu2 %v839_v34  ;;  %vm754_vm3 = vweird.f32 %v745_v32 }
 0x395   :  { %v586_v46 = vmul.f32 %v582_v44, %v1282_v12 }
 0x396   :  { %594 = vrot.lane.b32.xlu0 %v585_v21, %s1023_s4  ;;  %v979_v43 = vpop.eup %978 }
 0x397   :  { %596 = vrot.lane.b32.xlu2 %v586_v46, %s1023_s4  ;;  %v750_v9 = vmul.f32 %v979_v43, %v745_v32  ;;  %vm755_vm2 = vweird.f32 %v979_v43 }
 0x398   :  { %vm756_vm5 = vmor %vm754_vm3, %vm755_vm2 }
 0x399   :  { %v751_v21 = vsub.f32 1.0, %v750_v9 }
 0x39b   :  { %v752_v44 = vmul.f32 %v979_v43, %v751_v21 }
 0x39d   :  { %v753_v46 = vadd.f32 %v979_v43, %v752_v44 }
 0x3e2   :  { %v593_v60 = vpop.permute.xlu2 %592 }
 0x3e3   :  { %v604_v48 = vadd.f32 %v593_v60, %v536_v11  ;;  %v625_v11 = vsel %vm612_vm14, %v624_v3, 1.0  ;;  %v760_v60 = vand.u32 2147483648, %v745_v32 }
 0x3e4   :  { %v681_v13 = vmul.f32 %v625_v11, %v1298_v20  ;;  %v922_v11 = vmul.f32 -1.442695, %v1333_v33 }
 0x3e5   :  { %633 = vrot.lane.b32.xlu1 %v604_v48, %s1023_s4 }
 0x3e6   :  { %v709_v25 = vmul.f32 0.0, %v681_v13 }
 0x3f1   :  { %v599_v1 = vpop.permute.xlu1 %598  ;;  %v597_v49 = vpop.permute.xlu2 %596 }
 0x3f2   :  { %v1394_v50 = vadd.f32 %v599_v1, %v539_v14  ;;  %v606_v51 = vadd.f32 %v597_v49, %v538_v7  ;;  %v627_v14 = vsel %vm614_vm15, %v622_v24, 1.0  ;;  %v757_v49 = vsel %vm756_vm5, %v979_v43, %v753_v46 }
 0x3f3   :  { %v683_v40 = vmul.f32 %v627_v14, %v1307_v5 }
 0x3f4   :  { %639 = vrot.lane.b32.xlu0 %v1394_v50, %s1023_s4  ;;  %637 = vrot.lane.b32.xlu1 %v606_v51, %s1023_s4 }
 0x408   :  { %v595_v61 = vpop.permute.xlu0 %594 }
 0x409   :  { %v1399_v12 = vadd.f32 %v595_v61, %v537_v16  ;;  %v711_v16 = vmul.f32 0.0, %v683_v40 }
 0x40b   :  { %635 = vrot.lane.b32.xlu2 %v1399_v12, %s1023_s4 }
 0x457   :  { %v634_v53 = vpop.permute.xlu1 %633 }
 0x458   :  { %v645_v54 = vrot.slane %v634_v53, 4 }
 0x465   :  { %v636_v52 = vpop.permute.xlu2 %635 }
 0x466   :  { %v646_v8 = vrot.slane %v636_v52, 4  ;;  %v640_v55 = vpop.permute.xlu0 %639  ;;  %v638_v57 = vpop.permute.xlu1 %637 }
 0x467   :  { %v648_v58 = vrot.slane %v640_v55, 4  ;;  %v647_v59 = vrot.slane %v638_v57, 4 }
 0x468   :  { %v651_v63 = vsel %vm620_vm4, %v645_v54, %v646_v8 }
 0x469   :  { %v652_v2 = vsel %vm620_vm4, %v648_v58, %v645_v54  ;;  %v650_v45 = vsel %vm620_vm4, %v646_v8, %v647_v59  ;;  %v649_v56 = vsel %vm620_vm4, %v647_v59, %v648_v58  ;;  %v658_v37 = vmul.f32 %v651_v63, %v1287_v15 }
 0x46a   :  { %v653_v6 = vsel %vm612_vm14, %v652_v2, 0.0  ;;  %v655_v47 = vsel %vm614_vm15, %v650_v45, 0.0  ;;  %v660_v27 = vmul.f32 %v649_v56, %v1303_v4  ;;  %v682_v8 = vmul.f32 %v1319_v28, %v1287_v15  ;;  %v992_v15 = vld [vmem:[%s1510_s0] sm:$0xff] }
 0x46b   :  { %v657_v7 = vmul.f32 %v653_v6, %v1298_v20  ;;  %v659_v10 = vmul.f32 %v655_v47, %v1307_v5  ;;  %v838_v5 = vld [vmem:[%s1513_s3 + $0x28] sm:$0xff]  ;;  %v684_v59 = vmul.f32 %v1327_v29, %v1303_v4 }
 0x46c   :  { %863 = vmatpush.msra.mxu2 %v838_v5 }
 0x46d   :  { %665 = vrot.lane.b32.xlu0 %v657_v7, %s1023_s4  ;;  %669 = vrot.lane.b32.xlu2 %v659_v10, %s1023_s4  ;;  %v921_v10 = vmul.f32 -1.442695, %v1331_v31 }
 0x46e   :  { %864 = vmatpush.msra.mxu2 %v837_v0 }
 0x46f   :  { %980 = vpow2.f32 %v921_v10 }
 0x470   :  { %865 = vmatpush.msra.mxu2 %v836_v26  ;;  %982 = vpow2.f32 %v922_v11 }
 0x472   :  { %866 = vmatpush.msra.mxu2 %v835_v17 }
 0x474   :  { %867 = vmatpush.msra.mxu2 %v834_v41 }
 0x475   :  { %717 = vrot.lane.b32.xlu2 %v709_v25, %s1023_s4  ;;  %v981_v13 = vpop.eup %980 }
 0x476   :  { %868 = vmatpush.msra.mxu2 %v833_v42  ;;  %v746_v24 = vadd.f32 1.0, %v981_v13  ;;  %v983_v25 = vpop.eup %982 }
 0x477   :  { %v747_v14 = vadd.f32 1.0, %v983_v25 }
 0x478   :  { %984 = vrcp.f32 %v746_v24  ;;  %vm769_vm8 = vweird.f32 %v746_v24 }
 0x479   :  { %v790_v41 = vand.u32 2147483648, %v747_v14  ;;  %vm784_vm12 = vweird.f32 %v747_v14  ;;  %v788_v42 = vand.u32 2147483647, %v747_v14 }
 0x47b   :  { %vm789_vm1 = vcmp.eq.f32.partialorder %v788_v42, 8.507059e+37 }
 0x47d   :  { %721 = vrot.lane.b32.xlu2 %v711_v16, %s1023_s4 }
 0x47e   :  { %v985_v40 = vpop.eup %984 }
 0x47f   :  { %v765_v16 = vmul.f32 %v985_v40, %v746_v24  ;;  %vm770_vm7 = vweird.f32 %v985_v40 }
 0x480   :  { %vm771_vm9 = vmor %vm769_vm8, %vm770_vm7 }
 0x4c7   :  { %v670_v62 = vpop.permute.xlu2 %669 }
 0x4c8   :  { %v679_v20 = vadd.f32 %v670_v62, %v606_v51  ;;  %v761_v51 = vor.u32 1.1754944e-38, %v760_v60  ;;  %v791_v60 = vor.u32 1.1754944e-38, %v790_v41 }
 0x4ca   :  { %697 = vrot.lane.b32.xlu0 %v679_v20, %s1023_s4 }
 0x4cf   :  { %v718_v22 = vpop.permute.xlu2 %717 }
 0x4d7   :  { %v722_v1 = vpop.permute.xlu2 %721 }
 0x4d8   :  { %v731_v2 = vadd.f32 %v722_v1, %v679_v20  ;;  %v766_v20 = vsub.f32 1.0, %v765_v16 }
 0x4da   :  { %v767_v5 = vmul.f32 %v985_v40, %v766_v20 }
 0x4dc   :  { %v768_v26 = vadd.f32 %v985_v40, %v767_v5 }
 0x4df   :  { %v666_v18 = vpop.permute.xlu0 %665 }
 0x4e0   :  { %v677_v19 = vadd.f32 %v666_v18, %v604_v48  ;;  %v758_v48 = vand.u32 2147483647, %v745_v32  ;;  %v775_v18 = vand.u32 2147483648, %v746_v24 }
 0x4e2   :  { %v729_v36 = vadd.f32 %v718_v22, %v677_v19  ;;  %693 = vrot.lane.b32.xlu1 %v677_v19, %s1023_s4  ;;  %vm759_vm6 = vcmp.eq.f32.partialorder %v758_v48, 8.507059e+37  ;;  %v773_v19 = vand.u32 2147483647, %v746_v24 }
 0x4e3   :  { %v762_v61 = vsel %vm759_vm6, %v761_v51, %v757_v49 }
 0x4e4   :  { %817 = vrot.lane.b32.xlu2 %v729_v36, %s1023_s4  ;;  %v809_v53 = vmul.f32 %v762_v61, %v1329_v30  ;;  %vm774_vm10 = vcmp.eq.f32.partialorder %v773_v19, 8.507059e+37 }
 0x4ea   :  { %667 = vrot.lane.b32.xlu1 %v658_v37, %s1023_s4  ;;  %v772_v37 = vsel %vm771_vm9, %v985_v40, %v768_v26 }
 0x4f2   :  { %671 = vrot.lane.b32.xlu1 %v660_v27, %s1023_s4  ;;  %v776_v27 = vor.u32 1.1754944e-38, %v775_v18 }
 0x4f4   :  { %v777_v38 = vsel %vm774_vm10, %v776_v27, %v772_v37 }
 0x4f5   :  { %v810_v43 = vmul.f32 %v777_v38, %v1331_v31 }
 0x53c   :  { %v698_v58 = vpop.permute.xlu0 %697 }
 0x53d   :  { %v712_v63 = vmul.f32 %v698_v58, %v684_v59 }
 0x53e   :  { %v818_v52 = vpop.permute.xlu2 %817 }
 0x53f   :  { %v829_v54 = vmul.f32 %v818_v52, %v809_v53 }
 0x541   :  { %924 = vmatmul.msk.f32.vlgmr.msra.gmra.mxu2 %vm29_vm0, %v829_v54 }
 0x554   :  { %v694_v55 = vpop.permute.xlu1 %693 }
 0x555   :  { %v710_v57 = vmul.f32 %v694_v55, %v682_v8 }
 0x557   :  { %719 = vrot.lane.b32.xlu0 %v710_v57, %s1023_s4 }
 0x55c   :  { %v668_v30 = vpop.permute.xlu1 %667 }
 0x55d   :  { %v678_v3 = vadd.f32 %v668_v30, %v1399_v12  ;;  %v923_v12 = vmul.f32 -1.442695, %v1335_v35  ;;  %v994_v30 = vld [vmem:[%s1510_s0 + $0x10] sm:$0xff] }
 0x55f   :  { %723 = vrot.lane.b32.xlu0 %v712_v63, %s1023_s4  ;;  %986 = vpow2.f32 %v923_v12  ;;  %v993_v63 = vld [vmem:[%s1510_s0 + $0x8] sm:$0xff] }
 0x560   :  { %988 = vrcp.f32 %v747_v14 }
 0x564   :  { %v672_v4 = vpop.permute.xlu1 %671 }
 0x565   :  { %v680_v29 = vadd.f32 %v672_v4, %v1394_v50  ;;  %v987_v50 = vpop.eup %986 }
 0x566   :  { %v748_v62 = vadd.f32 1.0, %v987_v50  ;;  %v989_v23 = vpop.eup %988 }
 0x567   :  { %821 = vrot.lane.b32.xlu0 %v731_v2, %s1023_s4  ;;  %v780_v34 = vmul.f32 %v989_v23, %v747_v14  ;;  %vm785_vm11 = vweird.f32 %v989_v23 }
 0x568   :  { %990 = vrcp.f32 %v748_v62  ;;  %vm786_vm13 = vmor %vm784_vm12, %vm785_vm11  ;;  %v805_v49 = vand.u32 2147483648, %v748_v62  ;;  %vm799_vm14 = vweird.f32 %v748_v62  ;;  %v803_v61 = vand.u32 2147483647, %v748_v62 }
 0x569   :  { %v781_v0 = vsub.f32 1.0, %v780_v34 }
 0x56a   :  { %v806_v54 = vor.u32 1.1754944e-38, %v805_v49  ;;  %vm804_vm2 = vcmp.eq.f32.partialorder %v803_v61, 8.507059e+37 }
 0x56b   :  { %v782_v36 = vmul.f32 %v989_v23, %v781_v0 }
 0x56d   :  { %v783_v32 = vadd.f32 %v989_v23, %v782_v36 }
 0x56e   :  { %v991_v17 = vpop.eup %990 }
 0x56f   :  { %v795_v22 = vmul.f32 %v991_v17, %v748_v62  ;;  %v787_v44 = vsel %vm786_vm13, %v989_v23, %v783_v32  ;;  %vm800_vm4 = vweird.f32 %v991_v17 }
 0x570   :  { %v792_v48 = vsel %vm789_vm1, %v791_v60, %v787_v44  ;;  %vm801_vm15 = vmor %vm799_vm14, %vm800_vm4 }
 0x571   :  { %v796_v39 = vsub.f32 1.0, %v795_v22  ;;  %v811_v53 = vmul.f32 %v792_v48, %v1333_v33 }
 0x573   :  { %v797_v21 = vmul.f32 %v991_v17, %v796_v39 }
 0x575   :  { %v798_v1 = vadd.f32 %v991_v17, %v797_v21 }
 0x577   :  { %v802_v31 = vsel %vm801_vm15, %v991_v17, %v798_v1 }
 0x578   :  { %v807_v8 = vsel %vm804_vm2, %v806_v54, %v802_v31 }
 0x579   :  { %v812_v57 = vmul.f32 %v807_v8, %v1335_v35 }
 0x5c4   :  { %v870_v45 = vpop.f32.mrf.mxu2 }
 0x5c5   :  { %v882_v28 = vadd.f32 %v992_v15, %v870_v45  ;;  %v995_v15 = vld [vmem:[%s1510_s0 + $0x18] sm:$0xff] }
 0x5c7   :  { %886 = vst.msk [vmem:[#allocation2] sm:$0xff] %vm29_vm0, %v882_v28 }
 0x5c9   :  { %v720_v56 = vpop.permute.xlu0 %719 }
 0x5ca   :  { %v730_v6 = vadd.f32 %v720_v56, %v678_v3 }
 0x5cc   :  { %819 = vrot.lane.b32.xlu1 %v730_v6, %s1023_s4 }
 0x5d1   :  { %v724_v47 = vpop.permute.xlu0 %723 }
 0x5d2   :  { %v732_v7 = vadd.f32 %v724_v47, %v680_v29 }
 0x5d4   :  { %823 = vrot.lane.b32.xlu2 %v732_v7, %s1023_s4 }
 0x5d9   :  { %v822_v51 = vpop.permute.xlu0 %821 }
 0x5da   :  { %v831_v52 = vmul.f32 %v822_v51, %v811_v53 }
 0x62e   :  { %v824_v55 = vpop.permute.xlu2 %823 }
 0x62f   :  { %v832_v58 = vmul.f32 %v824_v55, %v812_v57 }
 0x63e   :  { %v820_v9 = vpop.permute.xlu1 %819 }
 0x63f   :  { %v830_v46 = vmul.f32 %v820_v9, %v810_v43 }
 0x641   :  { %925 = vmatmul.msk.f32.gmra.mxu2 %vm29_vm0, %v830_v46 }
 0x649   :  { %926 = vmatmul.msk.f32.gmra.mxu2 %vm29_vm0, %v831_v52 }
 0x651   :  { %927 = vmatmul.msk.f32.gmra.mxu2 %vm29_vm0, %v832_v58 }
 0x6c4   :  { %v873_v59 = vpop.f32.mrf.mxu2 }
 0x6c5   :  { %v883_v33 = vadd.f32 %v993_v63, %v873_v59 }
 0x6c7   :  { %887 = vst.msk [vmem:[#allocation2 + $0x8] sm:$0xff] %vm29_vm0, %v883_v33 }
 0x6cc   :  { %v876_v2 = vpop.f32.mrf.mxu2 }
 0x6cd   :  { %v884_v45 = vadd.f32 %v994_v30, %v876_v2 }
 0x6cf   :  { %888 = vst.msk [vmem:[#allocation2 + $0x10] sm:$0xff] %vm29_vm0, %v884_v45 }
 0x6d4   :  { %v879_v35 = vpop.f32.mrf.mxu2 }
 0x6d5   :  { %v885_v28 = vadd.f32 %v995_v15, %v879_v35 }
 0x6d7   :  { %889 = vst.msk [vmem:[#allocation2 + $0x18] sm:$0xff] %vm29_vm0, %v885_v28 }
 0x6d8   :  { %902 = dma.vmem_to_hbm [thread:$0]  %s895_s7, 512, %s897_s1, [#allocation3], %s1025_s10, %s1025_s10, %s1026_s11  }
 0x6d9   :  { %1020 = dma.done.wait [#allocation3], 512  }
 0x6da   :  { %1021 = vsyncadd [#allocation3], 4294966784 }
 0x6db   :  { %907 = vsyncpa [#allocation3], 1 }

</bundles_post_ra>
